<compile_context>
chip_gen: v6e
topology: v6e:2x2x1
jax: 0.10.0
libtpu: 0.0.40
codegen_flags: <defaults>
</compile_context>

<pallas_src>
import jax
import jax.numpy as jnp
import numpy as np
from jax import lax
from jax.experimental import pallas as pl
from jax.experimental.pallas import tpu as pltpu

BN_EPS = 1e-5


def se_bottleneck(x_nchw, kernel_params):
    N, Cin, H, W = x_nchw.shape
    w2t = kernel_params[2]          # (P, 9P)  (BN2 scale already folded in)
    w3t = kernel_params[4]          # (C2, P)
    P = w2t.shape[0]
    C2 = w3t.shape[0]
    HW = H * W

    # Fold as many images as reasonable into one grid step so the lane (M)
    # dimension of every matmul is large; the per-step working set stays tiny.
    bb = min(N, max(1, 1024 // HW))
    while N % bb:
        bb -= 1
    G = N // bb
    M = bb * HW

    # NCHW -> per-block (Cin, bb*HW), pixels on the lane axis.
    xt = (x_nchw.astype(jnp.float32)
          .reshape(G, bb, Cin, HW)
          .transpose(0, 2, 1, 3)
          .reshape(G, Cin, M))

    # ---- host-precomputed static helpers (depend only on H, W, bb) ----
    li = np.arange(M)
    pi = (li % HW) // W                                   # row within image
    pj = li % W                                           # col within image
    tap_masks = []
    for t in range(9):
        dh, dw = t // 3 - 1, t % 3 - 1
        valid = ((pi + dh >= 0) & (pi + dh < H) &
                 (pj + dw >= 0) & (pj + dw < W))
        tap_masks.append(valid)
    tap_mask = jnp.asarray(np.stack(tap_masks).astype(np.float32))   # (9, M)

    img = li // HW
    pool_m = jnp.asarray(
        (img[:, None] == np.arange(bb)[None, :]).astype(np.float32) / HW)  # (M, bb)
    expand_m = jnp.asarray(
        (np.arange(bb)[:, None] == img[None, :]).astype(np.float32))       # (bb, M)

    def kernel(x_ref,
               w1p_ref, b1p_ref,
               w2_ref, b2_ref,
               w3_ref, b3_ref,
               wf1_ref, bf1_ref, wf2_ref, bf2_ref,
               mask_ref, pool_ref, exp_ref,
               o_ref):
        xv = x_ref[0].astype(jnp.bfloat16)                       # (Cin, M)

        # ---- fused conv1 (1x1) + residual projection (1x1); BN scales are
        #      folded into the weights, so only a bias add remains ----
        h0 = (jnp.dot(w1p_ref[...], xv, preferred_element_type=jnp.float32)
              + b1p_ref[...])                                    # (P + C2, M)
        h1 = jnp.maximum(h0[:P, :], 0.0)                         # conv1+bn1+relu
        res = h0[P:, :]                                          # projection+bn

        # ---- conv2 3x3 SAME: im2col via lane rolls + precomputed border
        #      masks, then one K = 9P matmul on the MXU ----
        taps = []
        for t in range(9):
            dh, dw = t // 3 - 1, t % 3 - 1
            off = dh * W + dw
            rolled = pltpu.roll(h1, (-off) % M, 1) if off else h1
            taps.append(rolled * mask_ref[t:t + 1, :])
        slab = jnp.concatenate(taps, axis=0).astype(jnp.bfloat16)   # (9P, M)
        h2 = jnp.maximum(
            jnp.dot(w2_ref[...], slab, preferred_element_type=jnp.float32)
            + b2_ref[...], 0.0)                                      # (P, M)

        # ---- conv3 (1x1) + bn3 (scale folded) ----
        h3 = (jnp.dot(w3_ref[...], h2.astype(jnp.bfloat16),
                      preferred_element_type=jnp.float32)
              + b3_ref[...])                                         # (C2, M)

        # ---- SELayer: per-image global average pool -> fc -> relu -> fc
        #      -> sigmoid -> rescale.  Pool / broadcast use tiny precomputed
        #      block-indicator matmuls (stays lane-dense, no lane reshapes).
        pooled = jnp.dot(h3, pool_ref[...],
                         preferred_element_type=jnp.float32)         # (C2, bb)
        y = jnp.maximum(
            jnp.dot(wf1_ref[...], pooled,
                    preferred_element_type=jnp.float32) + bf1_ref[...], 0.0)
        y = jax.nn.sigmoid(
            jnp.dot(wf2_ref[...], y,
                    preferred_element_type=jnp.float32) + bf2_ref[...])  # (C2, bb)
        scale = jnp.dot(y, exp_ref[...],
                        preferred_element_type=jnp.float32)              # (C2, M)

        # ---- SE rescale + residual add + final relu (lane-dense store) ----
        o_ref[0] = jnp.maximum(h3 * scale + res, 0.0)

    def full_spec(arr):
        nd = arr.ndim
        return pl.BlockSpec(arr.shape, lambda g, _nd=nd: (0,) * _nd)

    static_params = (tap_mask, pool_m, expand_m)
    out = pl.pallas_call(
        kernel,
        out_shape=jax.ShapeDtypeStruct((G, C2, M), jnp.float32),
        grid_spec=pltpu.PrefetchScalarGridSpec(
            num_scalar_prefetch=0,
            grid=(G,),
            in_specs=[pl.BlockSpec((1, Cin, M), lambda g: (g, 0, 0))]
                     + [full_spec(a) for a in kernel_params]
                     + [full_spec(a) for a in static_params],
            out_specs=pl.BlockSpec((1, C2, M), lambda g: (g, 0, 0)),
        ),
        compiler_params=pltpu.CompilerParams(
            dimension_semantics=("parallel",)),
    )(xt, *kernel_params, *static_params)

    # (G, C2, bb*HW) -> NCHW
    return (out.reshape(G, C2, bb, HW)
               .transpose(0, 2, 1, 3)
               .reshape(N, C2, H, W))


# -------------------- deterministic parameter construction --------------------

def fold_bn(gamma, beta, mean, var, eps=BN_EPS):
    scale = gamma / jnp.sqrt(var + eps)
    shift = beta - mean * scale
    return scale, shift


def init_params(key, inplanes, planes, reduction=8):
    C2 = planes * 2                    # expansion = 2
    hid = C2 // reduction
    ks = jax.random.split(key, 12)

    def nrm(k, shape, scale=0.1):
        return scale * jax.random.normal(k, shape, jnp.float32)

    W1 = nrm(ks[0], (planes, inplanes))          # conv1 (out, in)
    W2 = nrm(ks[1], (planes, planes, 3, 3))      # conv2 OIHW
    W3 = nrm(ks[2], (C2, planes))                # conv3 (out, in)
    Wp = nrm(ks[3], (C2, inplanes))              # projection conv (64, 32)
    Wf1 = nrm(ks[4], (hid, C2))                  # SE fc1 (torch Linear: out,in)
    bf1 = nrm(ks[5], (hid,))
    Wf2 = nrm(ks[6], (C2, hid))                  # SE fc2
    bf2 = nrm(ks[7], (C2,))

    def bn_stats(k, c):
        k1, k2, k3, k4 = jax.random.split(k, 4)
        gamma = 1.0 + 0.1 * jax.random.normal(k1, (c,), jnp.float32)
        beta = 0.1 * jax.random.normal(k2, (c,), jnp.float32)
        mean = 0.1 * jax.random.normal(k3, (c,), jnp.float32)
        var = 0.5 + jax.random.uniform(k4, (c,), jnp.float32)
        return gamma, beta, mean, var

    bn1 = bn_stats(ks[8], planes)
    bn2 = bn_stats(ks[9], planes)
    bn3 = bn_stats(ks[10], C2)
    bnp = bn_stats(ks[11], C2)

    s1, b1 = fold_bn(*bn1)
    s2, b2 = fold_bn(*bn2)
    s3, b3 = fold_bn(*bn3)
    sp, bp = fold_bn(*bnp)

    # --- kernel-layout parameters: BN scales folded into the (bf16) weights,
    #     conv1 + projection fused along the output-channel (sublane) axis ---
    w1p = jnp.concatenate([W1 * s1[:, None],
                           Wp * sp[:, None]], axis=0).astype(jnp.bfloat16)
    b1p = jnp.concatenate([b1, bp], axis=0)[:, None]               # (P+C2, 1)
    # (P_out, 3, 3, P_in) -> (P_out, 9*P_in); row block t = kh*3+kw matches the
    # kernel's tap ordering (tap t reads input pixel shifted by (kh-1, kw-1)).
    w2t = (jnp.transpose(W2, (0, 2, 3, 1)).reshape(planes, 9 * planes)
           * s2[:, None]).astype(jnp.bfloat16)
    w3t = (W3 * s3[:, None]).astype(jnp.bfloat16)

    kernel_params = (w1p, b1p,
                     w2t, b2[:, None],
                     w3t, b3[:, None],
                     Wf1, bf1[:, None], Wf2, bf2[:, None])
    raw_params = (W1, W2, W3, Wp, Wf1, bf1, Wf2, bf2, bn1, bn2, bn3, bnp)
    return kernel_params, raw_params


# ----------- pure-JAX f32 reference (PyTorch NCHW semantics) -----------

def reference(x, raw):
    W1, W2, W3, Wp, Wf1, bf1, Wf2, bf2, bn1, bn2, bn3, bnp = raw

    def conv(z, w_oihw, pad=0):
        return lax.conv_general_dilated(
            z, w_oihw, (1, 1), [(pad, pad), (pad, pad)],
            dimension_numbers=('NCHW', 'OIHW', 'NCHW'))

    def bn(z, p):
        g, b, m, v = p
        inv = (g / jnp.sqrt(v + BN_EPS))[None, :, None, None]
        return (z - m[None, :, None, None]) * inv + b[None, :, None, None]

    out = jax.nn.relu(bn(conv(x, W1[:, :, None, None]), bn1))
    out = jax.nn.relu(bn(conv(out, W2, 1), bn2))
    out = bn(conv(out, W3[:, :, None, None]), bn3)
    y = jnp.mean(out, axis=(2, 3))                        # (N, C2)
    y = jax.nn.relu(y @ Wf1.T + bf1)
    y = jax.nn.sigmoid(y @ Wf2.T + bf2)
    out = out * y[:, :, None, None]
    res = bn(conv(x, Wp[:, :, None, None]), bnp)
    return jax.nn.relu(out + res)


if __name__ == "__main__":
    # inplanes=32, planes=32 -> out channels = 64 != 32, so the hard-coded
    # projection Conv2d(32, 64, 1x1) path of the module is exercised.
    inplanes, planes = 32, 32
    N, H, W = 2, 8, 8

    key = jax.random.PRNGKey(0)
    kx, kp = jax.random.split(key)
    x = jax.random.normal(kx, (N, inplanes, H, W), jnp.float32)

    kernel_params, raw_params = init_params(kp, inplanes, planes, reduction=8)

    out = jax.block_until_ready(se_bottleneck(x, kernel_params))

    ref = reference(x, raw_params)
    # Tolerance relaxed (f32 reference vs bf16 matmul operands / folded BN
    # scales in the kernel).
    np.testing.assert_allclose(np.asarray(out), np.asarray(ref),
                               rtol=5e-2, atol=5e-2)
    print("KERNEL_OK")
</pallas_src>

<mosaic_0001>
module attributes {stable_mosaic.version = 11 : i64} {
  func.func @kernel(%arg0: i32, %arg1: memref<1x32x128xf32, #tpu.memory_space<vmem>>, %arg2: memref<96x32xbf16, #tpu.memory_space<vmem>>, %arg3: memref<96x1xf32, #tpu.memory_space<vmem>>, %arg4: memref<32x288xbf16, #tpu.memory_space<vmem>>, %arg5: memref<32x1xf32, #tpu.memory_space<vmem>>, %arg6: memref<64x32xbf16, #tpu.memory_space<vmem>>, %arg7: memref<64x1xf32, #tpu.memory_space<vmem>>, %arg8: memref<8x64xf32, #tpu.memory_space<vmem>>, %arg9: memref<8x1xf32, #tpu.memory_space<vmem>>, %arg10: memref<64x8xf32, #tpu.memory_space<vmem>>, %arg11: memref<64x1xf32, #tpu.memory_space<vmem>>, %arg12: memref<9x128xf32, #tpu.memory_space<vmem>>, %arg13: memref<128x2xf32, #tpu.memory_space<vmem>>, %arg14: memref<2x128xf32, #tpu.memory_space<vmem>>, %arg15: memref<1x64x128xf32, #tpu.memory_space<vmem>>) attributes {dimension_semantics = [#tpu.dimension_semantics<parallel>], iteration_bounds = array<i64: 1>, scalar_prefetch = 0 : i64, scratch_operands = 0 : i64, tpu.core_type = #tpu.core_type<tc>, window_params = [{transform_indices = @transform_0, window_bounds = array<i64: 1, 32, 128>}, {pipeline_mode = #tpu.pipeline_mode<synchronous>, transform_indices = @transform_1, window_bounds = array<i64: 96, 32>}, {pipeline_mode = #tpu.pipeline_mode<synchronous>, transform_indices = @transform_2, window_bounds = array<i64: 96, 1>}, {pipeline_mode = #tpu.pipeline_mode<synchronous>, transform_indices = @transform_3, window_bounds = array<i64: 32, 288>}, {pipeline_mode = #tpu.pipeline_mode<synchronous>, transform_indices = @transform_4, window_bounds = array<i64: 32, 1>}, {pipeline_mode = #tpu.pipeline_mode<synchronous>, transform_indices = @transform_5, window_bounds = array<i64: 64, 32>}, {pipeline_mode = #tpu.pipeline_mode<synchronous>, transform_indices = @transform_6, window_bounds = array<i64: 64, 1>}, {pipeline_mode = #tpu.pipeline_mode<synchronous>, transform_indices = @transform_7, window_bounds = array<i64: 8, 64>}, {pipeline_mode = #tpu.pipeline_mode<synchronous>, transform_indices = @transform_8, window_bounds = array<i64: 8, 1>}, {pipeline_mode = #tpu.pipeline_mode<synchronous>, transform_indices = @transform_9, window_bounds = array<i64: 64, 8>}, {pipeline_mode = #tpu.pipeline_mode<synchronous>, transform_indices = @transform_10, window_bounds = array<i64: 64, 1>}, {pipeline_mode = #tpu.pipeline_mode<synchronous>, transform_indices = @transform_11, window_bounds = array<i64: 9, 128>}, {pipeline_mode = #tpu.pipeline_mode<synchronous>, transform_indices = @transform_12, window_bounds = array<i64: 128, 2>}, {pipeline_mode = #tpu.pipeline_mode<synchronous>, transform_indices = @transform_13, window_bounds = array<i64: 2, 128>}, {transform_indices = @transform_14, window_bounds = array<i64: 1, 64, 128>}]} {
    %c0 = arith.constant 0 : index
    %c0_0 = arith.constant 0 : index
    %c0_1 = arith.constant 0 : index
    %0 = vector.load %arg1[%c0, %c0_0, %c0_1] : memref<1x32x128xf32, #tpu.memory_space<vmem>>, vector<1x32x128xf32>
    %1 = vector.shape_cast %0 : vector<1x32x128xf32> to vector<32x128xf32>
    %2 = arith.truncf %1 : vector<32x128xf32> to vector<32x128xbf16>
    %c0_2 = arith.constant 0 : index
    %c0_3 = arith.constant 0 : index
    %3 = vector.load %arg2[%c0_2, %c0_3] : memref<96x32xbf16, #tpu.memory_space<vmem>>, vector<96x32xbf16>
    %cst = arith.constant dense<0.000000e+00> : vector<96x128xf32>
    %4 = tpu.matmul %3, %2, %cst {dimension_numbers = #tpu.dot_dimension_numbers<[1], [0], [0], [1], [0, 0, 1, 1], [], []>} : vector<96x32xbf16>, vector<32x128xbf16>, vector<96x128xf32> -> vector<96x128xf32>
    %c0_4 = arith.constant 0 : index
    %c0_5 = arith.constant 0 : index
    %5 = vector.load %arg3[%c0_4, %c0_5] : memref<96x1xf32, #tpu.memory_space<vmem>>, vector<96x1xf32>
    %6 = vector.broadcast %5 : vector<96x1xf32> to vector<96x128xf32>
    %7 = arith.addf %4, %6 : vector<96x128xf32>
    %8 = vector.extract_strided_slice %7 {offsets = [0, 0], sizes = [32, 128], strides = [1, 1]} : vector<96x128xf32> to vector<32x128xf32>
    %cst_6 = arith.constant 0.000000e+00 : f32
    %9 = vector.broadcast %cst_6 : f32 to vector<32x128xf32>
    %10 = arith.maximumf %8, %9 : vector<32x128xf32>
    %11 = vector.extract_strided_slice %7 {offsets = [32, 0], sizes = [64, 128], strides = [1, 1]} : vector<96x128xf32> to vector<64x128xf32>
    %c9_i32 = arith.constant 9 : i32
    %12 = tpu.dynamic_rotate %10 by %c9_i32 dim 1 : vector<32x128xf32>, i32 -> vector<32x128xf32>
    %c0_7 = arith.constant 0 : index
    %c0_8 = arith.constant 0 : index
    %13 = vector.load %arg12[%c0_7, %c0_8] : memref<9x128xf32, #tpu.memory_space<vmem>>, vector<1x128xf32>
    %14 = vector.broadcast %13 : vector<1x128xf32> to vector<32x128xf32>
    %15 = arith.mulf %12, %14 : vector<32x128xf32>
    %c8_i32 = arith.constant 8 : i32
    %16 = tpu.dynamic_rotate %10 by %c8_i32 dim 1 : vector<32x128xf32>, i32 -> vector<32x128xf32>
    %c1 = arith.constant 1 : index
    %c0_9 = arith.constant 0 : index
    %17 = vector.load %arg12[%c1, %c0_9] : memref<9x128xf32, #tpu.memory_space<vmem>>, vector<1x128xf32>
    %18 = vector.broadcast %17 : vector<1x128xf32> to vector<32x128xf32>
    %19 = arith.mulf %16, %18 : vector<32x128xf32>
    %c7_i32 = arith.constant 7 : i32
    %20 = tpu.dynamic_rotate %10 by %c7_i32 dim 1 : vector<32x128xf32>, i32 -> vector<32x128xf32>
    %c2 = arith.constant 2 : index
    %c0_10 = arith.constant 0 : index
    %21 = vector.load %arg12[%c2, %c0_10] : memref<9x128xf32, #tpu.memory_space<vmem>>, vector<1x128xf32>
    %22 = vector.broadcast %21 : vector<1x128xf32> to vector<32x128xf32>
    %23 = arith.mulf %20, %22 : vector<32x128xf32>
    %c1_i32 = arith.constant 1 : i32
    %24 = tpu.dynamic_rotate %10 by %c1_i32 dim 1 : vector<32x128xf32>, i32 -> vector<32x128xf32>
    %c3 = arith.constant 3 : index
    %c0_11 = arith.constant 0 : index
    %25 = vector.load %arg12[%c3, %c0_11] : memref<9x128xf32, #tpu.memory_space<vmem>>, vector<1x128xf32>
    %26 = vector.broadcast %25 : vector<1x128xf32> to vector<32x128xf32>
    %27 = arith.mulf %24, %26 : vector<32x128xf32>
    %c4 = arith.constant 4 : index
    %c0_12 = arith.constant 0 : index
    %28 = vector.load %arg12[%c4, %c0_12] : memref<9x128xf32, #tpu.memory_space<vmem>>, vector<1x128xf32>
    %29 = vector.broadcast %28 : vector<1x128xf32> to vector<32x128xf32>
    %30 = arith.mulf %10, %29 : vector<32x128xf32>
    %c127_i32 = arith.constant 127 : i32
    %31 = tpu.dynamic_rotate %10 by %c127_i32 dim 1 : vector<32x128xf32>, i32 -> vector<32x128xf32>
    %c5 = arith.constant 5 : index
    %c0_13 = arith.constant 0 : index
    %32 = vector.load %arg12[%c5, %c0_13] : memref<9x128xf32, #tpu.memory_space<vmem>>, vector<1x128xf32>
    %33 = vector.broadcast %32 : vector<1x128xf32> to vector<32x128xf32>
    %34 = arith.mulf %31, %33 : vector<32x128xf32>
    %c121_i32 = arith.constant 121 : i32
    %35 = tpu.dynamic_rotate %10 by %c121_i32 dim 1 : vector<32x128xf32>, i32 -> vector<32x128xf32>
    %c6 = arith.constant 6 : index
    %c0_14 = arith.constant 0 : index
    %36 = vector.load %arg12[%c6, %c0_14] : memref<9x128xf32, #tpu.memory_space<vmem>>, vector<1x128xf32>
    %37 = vector.broadcast %36 : vector<1x128xf32> to vector<32x128xf32>
    %38 = arith.mulf %35, %37 : vector<32x128xf32>
    %c120_i32 = arith.constant 120 : i32
    %39 = tpu.dynamic_rotate %10 by %c120_i32 dim 1 : vector<32x128xf32>, i32 -> vector<32x128xf32>
    %c7 = arith.constant 7 : index
    %c0_15 = arith.constant 0 : index
    %40 = vector.load %arg12[%c7, %c0_15] : memref<9x128xf32, #tpu.memory_space<vmem>>, vector<1x128xf32>
    %41 = vector.broadcast %40 : vector<1x128xf32> to vector<32x128xf32>
    %42 = arith.mulf %39, %41 : vector<32x128xf32>
    %c119_i32 = arith.constant 119 : i32
    %43 = tpu.dynamic_rotate %10 by %c119_i32 dim 1 : vector<32x128xf32>, i32 -> vector<32x128xf32>
    %c8 = arith.constant 8 : index
    %c0_16 = arith.constant 0 : index
    %44 = vector.load %arg12[%c8, %c0_16] : memref<9x128xf32, #tpu.memory_space<vmem>>, vector<1x128xf32>
    %45 = vector.broadcast %44 : vector<1x128xf32> to vector<32x128xf32>
    %46 = arith.mulf %43, %45 : vector<32x128xf32>
    %47 = tpu.concatenate %15, %19, %23, %27, %30, %34, %38, %42, %46 in 0 : vector<32x128xf32>, vector<32x128xf32>, vector<32x128xf32>, vector<32x128xf32>, vector<32x128xf32>, vector<32x128xf32>, vector<32x128xf32>, vector<32x128xf32>, vector<32x128xf32> -> vector<288x128xf32>
    %48 = arith.truncf %47 : vector<288x128xf32> to vector<288x128xbf16>
    %c0_17 = arith.constant 0 : index
    %c0_18 = arith.constant 0 : index
    %49 = vector.load %arg4[%c0_17, %c0_18] : memref<32x288xbf16, #tpu.memory_space<vmem>>, vector<32x288xbf16>
    %cst_19 = arith.constant dense<0.000000e+00> : vector<32x128xf32>
    %50 = tpu.matmul %49, %48, %cst_19 {dimension_numbers = #tpu.dot_dimension_numbers<[1], [0], [0], [1], [0, 0, 1, 1], [], []>} : vector<32x288xbf16>, vector<288x128xbf16>, vector<32x128xf32> -> vector<32x128xf32>
    %c0_20 = arith.constant 0 : index
    %c0_21 = arith.constant 0 : index
    %51 = vector.load %arg5[%c0_20, %c0_21] : memref<32x1xf32, #tpu.memory_space<vmem>>, vector<32x1xf32>
    %52 = vector.broadcast %51 : vector<32x1xf32> to vector<32x128xf32>
    %53 = arith.addf %50, %52 : vector<32x128xf32>
    %cst_22 = arith.constant 0.000000e+00 : f32
    %54 = vector.broadcast %cst_22 : f32 to vector<32x128xf32>
    %55 = arith.maximumf %53, %54 : vector<32x128xf32>
    %c0_23 = arith.constant 0 : index
    %c0_24 = arith.constant 0 : index
    %56 = vector.load %arg6[%c0_23, %c0_24] : memref<64x32xbf16, #tpu.memory_space<vmem>>, vector<64x32xbf16>
    %57 = arith.truncf %55 : vector<32x128xf32> to vector<32x128xbf16>
    %cst_25 = arith.constant dense<0.000000e+00> : vector<64x128xf32>
    %58 = tpu.matmul %56, %57, %cst_25 {dimension_numbers = #tpu.dot_dimension_numbers<[1], [0], [0], [1], [0, 0, 1, 1], [], []>} : vector<64x32xbf16>, vector<32x128xbf16>, vector<64x128xf32> -> vector<64x128xf32>
    %c0_26 = arith.constant 0 : index
    %c0_27 = arith.constant 0 : index
    %59 = vector.load %arg7[%c0_26, %c0_27] : memref<64x1xf32, #tpu.memory_space<vmem>>, vector<64x1xf32>
    %60 = vector.broadcast %59 : vector<64x1xf32> to vector<64x128xf32>
    %61 = arith.addf %58, %60 : vector<64x128xf32>
    %c0_28 = arith.constant 0 : index
    %c0_29 = arith.constant 0 : index
    %62 = vector.load %arg13[%c0_28, %c0_29] : memref<128x2xf32, #tpu.memory_space<vmem>>, vector<128x2xf32>
    %cst_30 = arith.constant dense<0.000000e+00> : vector<64x2xf32>
    %63 = tpu.matmul %61, %62, %cst_30 {dimension_numbers = #tpu.dot_dimension_numbers<[1], [0], [0], [1], [0, 0, 1, 1], [], []>} : vector<64x128xf32>, vector<128x2xf32>, vector<64x2xf32> -> vector<64x2xf32>
    %c0_31 = arith.constant 0 : index
    %c0_32 = arith.constant 0 : index
    %64 = vector.load %arg8[%c0_31, %c0_32] : memref<8x64xf32, #tpu.memory_space<vmem>>, vector<8x64xf32>
    %cst_33 = arith.constant dense<0.000000e+00> : vector<8x2xf32>
    %65 = tpu.matmul %64, %63, %cst_33 {dimension_numbers = #tpu.dot_dimension_numbers<[1], [0], [0], [1], [0, 0, 1, 1], [], []>} : vector<8x64xf32>, vector<64x2xf32>, vector<8x2xf32> -> vector<8x2xf32>
    %c0_34 = arith.constant 0 : index
    %c0_35 = arith.constant 0 : index
    %66 = vector.load %arg9[%c0_34, %c0_35] : memref<8x1xf32, #tpu.memory_space<vmem>>, vector<8x1xf32>
    %67 = vector.broadcast %66 : vector<8x1xf32> to vector<8x2xf32>
    %68 = arith.addf %65, %67 : vector<8x2xf32>
    %cst_36 = arith.constant 0.000000e+00 : f32
    %69 = vector.broadcast %cst_36 : f32 to vector<8x2xf32>
    %70 = arith.maximumf %68, %69 : vector<8x2xf32>
    %c0_37 = arith.constant 0 : index
    %c0_38 = arith.constant 0 : index
    %71 = vector.load %arg10[%c0_37, %c0_38] : memref<64x8xf32, #tpu.memory_space<vmem>>, vector<64x8xf32>
    %cst_39 = arith.constant dense<0.000000e+00> : vector<64x2xf32>
    %72 = tpu.matmul %71, %70, %cst_39 {dimension_numbers = #tpu.dot_dimension_numbers<[1], [0], [0], [1], [0, 0, 1, 1], [], []>} : vector<64x8xf32>, vector<8x2xf32>, vector<64x2xf32> -> vector<64x2xf32>
    %c0_40 = arith.constant 0 : index
    %c0_41 = arith.constant 0 : index
    %73 = vector.load %arg11[%c0_40, %c0_41] : memref<64x1xf32, #tpu.memory_space<vmem>>, vector<64x1xf32>
    %74 = vector.broadcast %73 : vector<64x1xf32> to vector<64x2xf32>
    %75 = arith.addf %72, %74 : vector<64x2xf32>
    %76 = arith.negf %75 : vector<64x2xf32>
    %77 = math.exp %76 : vector<64x2xf32>
    %cst_42 = arith.constant 1.000000e+00 : f32
    %78 = vector.broadcast %cst_42 : f32 to vector<64x2xf32>
    %79 = arith.addf %78, %77 : vector<64x2xf32>
    %80 = arith.divf %78, %79 : vector<64x2xf32>
    %c0_43 = arith.constant 0 : index
    %c0_44 = arith.constant 0 : index
    %81 = vector.load %arg14[%c0_43, %c0_44] : memref<2x128xf32, #tpu.memory_space<vmem>>, vector<2x128xf32>
    %cst_45 = arith.constant dense<0.000000e+00> : vector<64x128xf32>
    %82 = tpu.matmul %80, %81, %cst_45 {dimension_numbers = #tpu.dot_dimension_numbers<[1], [0], [0], [1], [0, 0, 1, 1], [], []>} : vector<64x2xf32>, vector<2x128xf32>, vector<64x128xf32> -> vector<64x128xf32>
    %83 = arith.mulf %61, %82 : vector<64x128xf32>
    %84 = arith.addf %83, %11 : vector<64x128xf32>
    %cst_46 = arith.constant 0.000000e+00 : f32
    %85 = vector.broadcast %cst_46 : f32 to vector<64x128xf32>
    %86 = arith.maximumf %84, %85 : vector<64x128xf32>
    %c0_47 = arith.constant 0 : index
    %c0_48 = arith.constant 0 : index
    %c0_49 = arith.constant 0 : index
    %87 = vector.load %arg15[%c0_47, %c0_48, %c0_49] : memref<1x64x128xf32, #tpu.memory_space<vmem>>, vector<1x64x128xf32>
    %88 = vector.shape_cast %87 : vector<1x64x128xf32> to vector<64x128xf32>
    %89 = vector.shape_cast %86 : vector<64x128xf32> to vector<1x64x128xf32>
    tpu.vector_store %arg15[%c0_47, %c0_48, %c0_49], %89 {strides = array<i32>} : memref<1x64x128xf32, #tpu.memory_space<vmem>>, vector<1x64x128xf32>,
    return
  }
  func.func @transform_0(%arg0: i32) -> (i32, i32, i32) {
    %c0_i32 = arith.constant 0 : i32
    %c0_i32_0 = arith.constant 0 : i32
    %c0_i32_1 = arith.constant 0 : i32
    return %arg0, %c0_i32, %c0_i32_0 : i32, i32, i32
  }
  func.func @transform_1(%arg0: i32) -> (i32, i32) {
    %c0_i32 = arith.constant 0 : i32
    %c0_i32_0 = arith.constant 0 : i32
    %c0_i32_1 = arith.constant 0 : i32
    return %c0_i32, %c0_i32_0 : i32, i32
  }
  func.func @transform_2(%arg0: i32) -> (i32, i32) {
    %c0_i32 = arith.constant 0 : i32
    %c0_i32_0 = arith.constant 0 : i32
    %c0_i32_1 = arith.constant 0 : i32
    return %c0_i32, %c0_i32_0 : i32, i32
  }
  func.func @transform_3(%arg0: i32) -> (i32, i32) {
    %c0_i32 = arith.constant 0 : i32
    %c0_i32_0 = arith.constant 0 : i32
    %c0_i32_1 = arith.constant 0 : i32
    return %c0_i32, %c0_i32_0 : i32, i32
  }
  func.func @transform_4(%arg0: i32) -> (i32, i32) {
    %c0_i32 = arith.constant 0 : i32
    %c0_i32_0 = arith.constant 0 : i32
    %c0_i32_1 = arith.constant 0 : i32
    return %c0_i32, %c0_i32_0 : i32, i32
  }
  func.func @transform_5(%arg0: i32) -> (i32, i32) {
    %c0_i32 = arith.constant 0 : i32
    %c0_i32_0 = arith.constant 0 : i32
    %c0_i32_1 = arith.constant 0 : i32
    return %c0_i32, %c0_i32_0 : i32, i32
  }
  func.func @transform_6(%arg0: i32) -> (i32, i32) {
    %c0_i32 = arith.constant 0 : i32
    %c0_i32_0 = arith.constant 0 : i32
    %c0_i32_1 = arith.constant 0 : i32
    return %c0_i32, %c0_i32_0 : i32, i32
  }
  func.func @transform_7(%arg0: i32) -> (i32, i32) {
    %c0_i32 = arith.constant 0 : i32
    %c0_i32_0 = arith.constant 0 : i32
    %c0_i32_1 = arith.constant 0 : i32
    return %c0_i32, %c0_i32_0 : i32, i32
  }
  func.func @transform_8(%arg0: i32) -> (i32, i32) {
    %c0_i32 = arith.constant 0 : i32
    %c0_i32_0 = arith.constant 0 : i32
    %c0_i32_1 = arith.constant 0 : i32
    return %c0_i32, %c0_i32_0 : i32, i32
  }
  func.func @transform_9(%arg0: i32) -> (i32, i32) {
    %c0_i32 = arith.constant 0 : i32
    %c0_i32_0 = arith.constant 0 : i32
    %c0_i32_1 = arith.constant 0 : i32
    return %c0_i32, %c0_i32_0 : i32, i32
  }
  func.func @transform_10(%arg0: i32) -> (i32, i32) {
    %c0_i32 = arith.constant 0 : i32
    %c0_i32_0 = arith.constant 0 : i32
    %c0_i32_1 = arith.constant 0 : i32
    return %c0_i32, %c0_i32_0 : i32, i32
  }
  func.func @transform_11(%arg0: i32) -> (i32, i32) {
    %c0_i32 = arith.constant 0 : i32
    %c0_i32_0 = arith.constant 0 : i32
    %c0_i32_1 = arith.constant 0 : i32
    return %c0_i32, %c0_i32_0 : i32, i32
  }
  func.func @transform_12(%arg0: i32) -> (i32, i32) {
    %c0_i32 = arith.constant 0 : i32
    %c0_i32_0 = arith.constant 0 : i32
    %c0_i32_1 = arith.constant 0 : i32
    return %c0_i32, %c0_i32_0 : i32, i32
  }
  func.func @transform_13(%arg0: i32) -> (i32, i32) {
    %c0_i32 = arith.constant 0 : i32
    %c0_i32_0 = arith.constant 0 : i32
    %c0_i32_1 = arith.constant 0 : i32
    return %c0_i32, %c0_i32_0 : i32, i32
  }
  func.func @transform_14(%arg0: i32) -> (i32, i32, i32) {
    %c0_i32 = arith.constant 0 : i32
    %c0_i32_0 = arith.constant 0 : i32
    %c0_i32_1 = arith.constant 0 : i32
    return %arg0, %c0_i32, %c0_i32_0 : i32, i32, i32
  }
}

</mosaic_0001>

<bundles_post_ra>
// kernel: tpu_custom_call.1
= control target key start
LH: loop header
LB: loop body
LE: loop exit
PB: predicated region body
PF: predicated region fallthrough
CT: control target
= control target key end

     0   :  { %vm169_vm0 = vcmask 261120   ;;  %v1755_v5 = vmov 0   ;;  %s2221_s0 = inlined_call_operand.vmem [shape: f32[1,32,128], index: 0, kind: input, shape index: {}]   ;;  %s2222_s1 = inlined_call_operand.vmem [shape: bf16[96,32], index: 1, kind: input, shape index: {}]   ;;  %s2223_s2 = inlined_call_operand.vmem [shape: f32[96,1], index: 2, kind: input, shape index: {}]   ;;  %s2224_s3 = inlined_call_operand.vmem [shape: bf16[32,288], index: 3, kind: input, shape index: {}]   ;;  %s2225_s4 = inlined_call_operand.vmem [shape: f32[32,1], index: 4, kind: input, shape index: {}]   ;;  %s2226_s5 = inlined_call_operand.vmem [shape: bf16[64,32], index: 5, kind: input, shape index: {}]   ;;  %s2227_s6 = inlined_call_operand.vmem [shape: f32[64,1], index: 6, kind: input, shape index: {}]   ;;  %s2228_s7 = inlined_call_operand.vmem [shape: f32[8,64], index: 7, kind: input, shape index: {}]   ;;  %s2229_s8 = inlined_call_operand.vmem [shape: f32[8,1], index: 8, kind: input, shape index: {}]   ;;  %s2230_s9 = inlined_call_operand.vmem [shape: f32[64,8], index: 9, kind: input, shape index: {}]   ;;  %s2231_s10 = inlined_call_operand.vmem [shape: f32[64,1], index: 10, kind: input, shape index: {}]   ;;  %s2232_s11 = inlined_call_operand.vmem [shape: f32[9,128], index: 11, kind: input, shape index: {}]   ;;  %s2233_s12 = inlined_call_operand.vmem [shape: f32[128,2], index: 12, kind: input, shape index: {}]   ;;  %s2234_s13 = inlined_call_operand.vmem [shape: f32[2,128], index: 13, kind: input, shape index: {}]   ;;  %s2235_s14 = inlined_call_operand.hbm [shape: f32[1,64,128], index: 14, kind: output, shape index: {}]  }
   0x1   :  { %v51_v0 = vld [vmem:[%s2221_s0 + $0x10] sm:$0xff]  ;;  %v52_v1 = vld [vmem:[%s2221_s0 + $0x18] sm:$0xff]  ;;  %v49_v2 = vld [vmem:[%s2221_s0] sm:$0xff]  ;;  %1681 = vset.pattern.permute.xlu0 %v1755_v5  ;;  %1682 = vset.pattern.permute.xlu1 %v1755_v5 }
   0x2   :  { %v54_v3 = vpack.c.bf16 %v52_v1, %v51_v0  ;;  %v50_v4 = vld [vmem:[%s2221_s0 + $0x8] sm:$0xff]  ;;  %v1683_v7 = vld [vmem:[%s2222_s1] sm:$0xff]   ;;  %v69_v8 = vld [vmem:[%s2223_s2 + $0x10] sm:$0xff] }
   0x3   :  { %v53_v6 = vpack.c.bf16 %v50_v4, %v49_v2  ;;  %1545 = vmatprep.mubr.msk.bf16.mxu1 %vm169_vm0, %v1683_v7  ;;  %v70_v9 = vld [vmem:[%s2223_s2 + $0x18] sm:$0xff]  ;;  %v67_v10 = vld [vmem:[%s2223_s2] sm:$0xff]  ;;  %v1684_v11 = vld [vmem:[%s2222_s1 + $0x8] sm:$0xff]   ;;  %91 = vperm.xlu0 %1681, %v69_v8  }
   0x4   :  { %1541 = vmatprep.subr.bf16.mxu1 %v54_v3  ;;  %v68_v12 = vld [vmem:[%s2223_s2 + $0x8] sm:$0xff]  ;;  %81 = vperm.xlu1 %1682, %v67_v10  }
   0x5   :  { %1542 = vmatpush3.bf16.msra.mxu1 %v54_v3 }
   0x6   :  { %1543 = vmatprep.subr.bf16.mxu1 %v53_v6 }
   0x7   :  { %96 = vperm.xlu0 %1681, %v70_v9  }
   0x8   :  { %86 = vperm.xlu1 %1682, %v68_v12  }
   0x9   :  { %1544 = vmatpush3.bf16.msra.mxu1 %v53_v6 }
   0xc   :  { %1546 = vmatmul.mubr.msk.bf16.vlgmr.msra.gmra.mxu1 %vm169_vm0, %v1684_v11 }
   0xd   :  { %19 = vsyncpa [#allocation3], 0  ;;  %v1685_v13 = vld [vmem:[%s2222_s1 + $0x10] sm:$0xff]   ;;  %v1686_v14 = vld [vmem:[%s2222_s1 + $0x18] sm:$0xff]   ;;  %s1756_s24 = smov 120   ;;  %s1758_s0 = smov 121  }
   0xe   :  { %1549 = vmatprep.mubr.msk.bf16.mxu1 %vm169_vm0, %v1685_v13  ;;  %v1687_v15 = vld [vmem:[%s2222_s1 + $0x20] sm:$0xff]   ;;  %v1688_v16 = vld [vmem:[%s2222_s1 + $0x28] sm:$0xff]   ;;  %s1757_s1 = smov 1   ;;  %s1759_s27 = smov 7   ;;  %v446_v42 = vld [vmem:[%s2225_s4 + $0x10] sm:$0xff]  ;;  %vm1765_vm1 = vmmov 0  }
   0xf   :  { %v1397_v29 = vld [vmem:[%s2232_s11 + $0x4] ss:$0 sm:$0xff]  ;;  %s1760_s28 = smov 127   ;;  %s1761_s29 = smov 8   ;;  %v1695_v41 = vld [vmem:[%s2224_s3 + $0x8] ss:$12 sps:$4 sm:$0xff]  }
  0x10   :  { %v1691_v40 = vld [vmem:[%s2224_s3 + $0x4] ss:$12 sps:$4 sm:$0xff]   ;;  %s1762_s16 = smov 9   ;;  %s1763_s17 = smov 119   ;;  %1561 = vmatprep.mubr.msk.bf16.mxu0 %vm169_vm0, %v1695_v41  ;;  %v447_v43 = vld [vmem:[%s2225_s4 + $0x18] sm:$0xff]  ;;  %v445_v45 = vld [vmem:[%s2225_s4 + $0x8] sm:$0xff] }
  0x11   :  { %v444_v44 = vld [vmem:[%s2225_s4] sm:$0xff]  ;;  %v617_v47 = vld [vmem:[%s2227_s6 + $0x8] sm:$0xff]  ;;  %v618_v48 = vld [vmem:[%s2227_s6 + $0x10] sm:$0xff]  ;;  %vm889_vm2 = vcmask 523264   ;;  %vm1020_vm3 = vcmask 64512   ;;  %vm1224_vm4 = vcmask 1041408  }
  0x12   :  { %v616_v46 = vld [vmem:[%s2227_s6] sm:$0xff]  ;;  %v619_v49 = vld [vmem:[%s2227_s6 + $0x18] sm:$0xff]  ;;  %v621_v51 = vld [vmem:[%s2227_s6 + $0x28] sm:$0xff]  ;;  %vm1199_vm5 = vcmask 15360  }
  0x13   :  { %v620_v50 = vld [vmem:[%s2227_s6 + $0x20] sm:$0xff]  ;;  %v622_v52 = vld [vmem:[%s2227_s6 + $0x30] sm:$0xff]  ;;  %v623_v53 = vld [vmem:[%s2227_s6 + $0x38] sm:$0xff] }
  0x14   :  { %1550 = vmatmul.mubr.msk.bf16.gmra.mxu1 %vm169_vm0, %v1686_v14  ;;  %v883_v54 = vld [vmem:[%s2229_s8] sm:$0xff]  ;;  %v973_v56 = vld [vmem:[%s2231_s10 + $0x8] sm:$0xff]  ;;  %v974_v57 = vld [vmem:[%s2231_s10 + $0x10] sm:$0xff] }
  0x15   :  { %1553 = vmatprep.mubr.msk.bf16.mxu1 %vm169_vm0, %v1687_v15  ;;  %v972_v55 = vld [vmem:[%s2231_s10] sm:$0xff]  ;;  %v975_v58 = vld [vmem:[%s2231_s10 + $0x18] sm:$0xff]  ;;  %v977_v60 = vld [vmem:[%s2231_s10 + $0x28] sm:$0xff] }
  0x16   :  { %v976_v59 = vld [vmem:[%s2231_s10 + $0x20] sm:$0xff]  ;;  %v978_v61 = vld [vmem:[%s2231_s10 + $0x30] sm:$0xff]  ;;  %v979_v62 = vld [vmem:[%s2231_s10 + $0x38] sm:$0xff] }
  0x17   :  { %v71_v63 = vld [vmem:[%s2223_s2 + $0x20] sm:$0xff]  ;;  %v72_v0 = vld [vmem:[%s2223_s2 + $0x28] sm:$0xff]  ;;  %v73_v1 = vld [vmem:[%s2223_s2 + $0x30] sm:$0xff] }
  0x18   :  { %v74_v2 = vld [vmem:[%s2223_s2 + $0x38] sm:$0xff]  ;;  %v75_v3 = vld [vmem:[%s2223_s2 + $0x40] sm:$0xff]  ;;  %v76_v4 = vld [vmem:[%s2223_s2 + $0x48] sm:$0xff] }
  0x19   :  { %v1400_v6 = vld [vmem:[%s2232_s11 + $0x7] ss:$0 sm:$0xff]  ;;  %v77_v7 = vld [vmem:[%s2223_s2 + $0x50] sm:$0xff]  ;;  %v78_v8 = vld [vmem:[%s2223_s2 + $0x58] sm:$0xff] }
  0x1a   :  { %v1396_v13 = vld [vmem:[%s2232_s11 + $0x3] ss:$0 sm:$0xff] }
  0x1c   :  { %1554 = vmatmul.mubr.msk.bf16.gmra.mxu1 %vm169_vm0, %v1688_v16 }
  0x1d   :  { %536 = vmatprep.mubr.bf16.mxu1 %v1691_v40 }
  0x7e   :  { %v92_v17 = vpop.permute.xlu0 %91 }
  0x7f   :  { %v82_v18 = vpop.permute.xlu1 %81 }
  0x82   :  { %v97_v22 = vpop.permute.xlu0 %96 }
  0x83   :  { %v87_v26 = vpop.permute.xlu1 %86 }
  0xcc   :  { %v1547_v19 = vpop.f32.mrf.mxu1 }
  0xcd   :  { %v231_v20 = vadd.f32 %v1547_v19, %v92_v17 }
  0xce   :  { %v222_v21 = vpop.f32.mrf.mxu1 }
  0xcf   :  { %v271_v23 = vmax.f32 %v231_v20, 0.0  ;;  %v223_v24 = vadd.f32 %v222_v21, %v82_v18 }
  0xd0   :  { %v1548_v25 = vpop.f32.mrf.mxu1 }
  0xd1   :  { %v234_v27 = vadd.f32 %v1548_v25, %v97_v22  ;;  %388 = vrot.lane.b32.xlu0 %v271_v23, %s1756_s24  ;;  %v269_v30 = vmax.f32 %v223_v24, 0.0  ;;  %v1896_v34 = vmul.f32 %v1397_v29, %v271_v23 }
  0xd2   :  { %v225_v28 = vpop.f32.mrf.mxu1 }
  0xd3   :  { %v272_v31 = vmax.f32 %v234_v27, 0.0  ;;  %v226_v32 = vadd.f32 %v225_v28, %v87_v26  ;;  %v1902_v37 = vmul.f32 %v1397_v29, %v269_v30 }
  0xd5   :  { %v270_v33 = vmax.f32 %v226_v32, 0.0  ;;  %328 = vrot.lane.b32.xlu0 %v271_v23, %s1757_s1  ;;  %390 = vrot.lane.b32.xlu1 %v272_v31, %s1756_s24  ;;  %v1898_v35 = vmul.f32 %v1397_v29, %v272_v31  ;;  %v1399_v32 = vld [vmem:[%s2232_s11 + $0x6] ss:$0 sm:$0xff] }
  0xd7   :  { %v427_v36 = vpack.c.bf16 %v1898_v35, %v1896_v34  ;;  %v1904_v38 = vmul.f32 %v1397_v29, %v270_v33  ;;  %v1689_v34 = vld [vmem:[%s2224_s3] ss:$12 sps:$4 sm:$0xff]  }
  0xd9   :  { %371 = vrot.lane.b32.xlu0 %v271_v23, %s1758_s0  ;;  %330 = vrot.lane.b32.xlu1 %v272_v31, %s1757_s1  ;;  %v426_v39 = vpack.c.bf16 %v1904_v38, %v1902_v37 }
  0xdd   :  { %311 = vrot.lane.b32.xlu0 %v271_v23, %s1759_s27  ;;  %373 = vrot.lane.b32.xlu1 %v272_v31, %s1758_s0 }
  0xe1   :  { %354 = vrot.lane.b32.xlu0 %v271_v23, %s1760_s28  ;;  %313 = vrot.lane.b32.xlu1 %v272_v31, %s1759_s27 }
  0xe5   :  { %294 = vrot.lane.b32.xlu0 %v271_v23, %s1761_s29  ;;  %356 = vrot.lane.b32.xlu1 %v272_v31, %s1760_s28 }
  0xe9   :  { %296 = vrot.lane.b32.xlu1 %v272_v31, %s1761_s29  ;;  %384 = vrot.lane.b32.xlu0 %v269_v30, %s1756_s24 }
  0xed   :  { %386 = vrot.lane.b32.xlu1 %v270_v33, %s1756_s24  ;;  %324 = vrot.lane.b32.xlu0 %v269_v30, %s1757_s1 }
  0xf1   :  { %326 = vrot.lane.b32.xlu1 %v270_v33, %s1757_s1  ;;  %367 = vrot.lane.b32.xlu0 %v269_v30, %s1758_s0 }
  0xf5   :  { %369 = vrot.lane.b32.xlu1 %v270_v33, %s1758_s0  ;;  %307 = vrot.lane.b32.xlu0 %v269_v30, %s1759_s27 }
  0xf9   :  { %309 = vrot.lane.b32.xlu1 %v270_v33, %s1759_s27  ;;  %350 = vrot.lane.b32.xlu0 %v269_v30, %s1760_s28 }
  0xfd   :  { %352 = vrot.lane.b32.xlu1 %v270_v33, %s1760_s28  ;;  %290 = vrot.lane.b32.xlu0 %v269_v30, %s1761_s29 }
 0x101   :  { %292 = vrot.lane.b32.xlu1 %v270_v33, %s1761_s29  ;;  %277 = vrot.lane.b32.xlu0 %v271_v23, %s1762_s16 }
 0x105   :  { %279 = vrot.lane.b32.xlu1 %v272_v31, %s1762_s16  ;;  %273 = vrot.lane.b32.xlu0 %v269_v30, %s1762_s16 }
 0x109   :  { %275 = vrot.lane.b32.xlu1 %v270_v33, %s1762_s16  ;;  %405 = vrot.lane.b32.xlu0 %v271_v23, %s1763_s17 }
 0x10d   :  { %407 = vrot.lane.b32.xlu1 %v272_v31, %s1763_s17  ;;  %401 = vrot.lane.b32.xlu0 %v269_v30, %s1763_s17 }
 0x111   :  { %403 = vrot.lane.b32.xlu1 %v270_v33, %s1763_s17  ;;  %460 = vperm.xlu0 %1681, %v446_v42  }
 0x115   :  { %465 = vperm.xlu1 %1682, %v447_v43   ;;  %450 = vperm.xlu0 %1681, %v444_v44  }
 0x119   :  { %455 = vperm.xlu1 %1682, %v445_v45   ;;  %626 = vperm.xlu0 %1681, %v616_v46   ;;  %v1395_v46 = vld [vmem:[%s2232_s11 + $0x2] ss:$0 sm:$0xff] }
 0x11d   :  { %631 = vperm.xlu1 %1682, %v617_v47   ;;  %636 = vperm.xlu0 %1681, %v618_v48  }
 0x121   :  { %641 = vperm.xlu1 %1682, %v619_v49   ;;  %646 = vperm.xlu0 %1681, %v620_v50  }
 0x125   :  { %651 = vperm.xlu1 %1682, %v621_v51   ;;  %656 = vperm.xlu0 %1681, %v622_v52  }
 0x129   :  { %661 = vperm.xlu1 %1682, %v623_v53   ;;  %886 = vperm.xlu0 %1681, %v883_v54  }
 0x12d   :  { %982 = vperm.xlu1 %1682, %v972_v55   ;;  %987 = vperm.xlu0 %1681, %v973_v56   ;;  %v1398_v55 = vld [vmem:[%s2232_s11 + $0x5] ss:$0 sm:$0xff] }
 0x131   :  { %992 = vperm.xlu1 %1682, %v974_v57   ;;  %997 = vperm.xlu0 %1681, %v975_v58  }
 0x135   :  { %1002 = vperm.xlu1 %1682, %v976_v59   ;;  %1007 = vperm.xlu0 %1681, %v977_v60  }
 0x139   :  { %1012 = vperm.xlu1 %1682, %v978_v61   ;;  %1017 = vperm.xlu0 %1681, %v979_v62  }
 0x13d   :  { %101 = vperm.xlu1 %1682, %v71_v63   ;;  %106 = vperm.xlu0 %1681, %v72_v0   ;;  %v1394_v0 = vld [vmem:[%s2232_s11 + $0x1] ss:$0 sm:$0xff] }
 0x141   :  { %111 = vperm.xlu1 %1682, %v73_v1   ;;  %116 = vperm.xlu0 %1681, %v74_v2  }
 0x143   :  { %v389_v5 = vpop.permute.xlu0 %388 }
 0x144   :  { %v399_v11 = vmul.f32 %v1400_v6, %v389_v5 }
 0x145   :  { %121 = vperm.xlu1 %1682, %v75_v3   ;;  %126 = vperm.xlu0 %1681, %v76_v4  }
 0x147   :  { %v329_v9 = vpop.permute.xlu0 %328  ;;  %v391_v10 = vpop.permute.xlu1 %390 }
 0x148   :  { %v400_v12 = vmul.f32 %v1400_v6, %v391_v10  ;;  %v339_v17 = vmul.f32 %v1396_v13, %v329_v9 }
 0x149   :  { %131 = vperm.xlu1 %1682, %v77_v7   ;;  %136 = vperm.xlu0 %1681, %v78_v8  }
 0x14a   :  { %v433_v14 = vpack.c.bf16 %v400_v12, %v399_v11 }
 0x14b   :  { %v372_v15 = vpop.permute.xlu0 %371  ;;  %v331_v16 = vpop.permute.xlu1 %330 }
 0x14c   :  { %v340_v18 = vmul.f32 %v1396_v13, %v331_v16  ;;  %1452 = vmatprep.subr.bf16.mxu1 %v433_v14  ;;  %v382_v45 = vmul.f32 %v1399_v32, %v372_v15  ;;  %v1393_v15 = vld [vmem:[%s2232_s11] ss:$0 sm:$0xff] }
 0x14e   :  { %v425_v19 = vpack.c.bf16 %v340_v18, %v339_v17 }
 0x14f   :  { %v312_v20 = vpop.permute.xlu0 %311  ;;  %v374_v21 = vpop.permute.xlu1 %373 }
 0x150   :  { %1453 = vmatpush3.bf16.msra.mxu1 %v425_v19  ;;  %v383_v40 = vmul.f32 %v1399_v32, %v374_v21  ;;  %v322_v52 = vmul.f32 %v1395_v46, %v312_v20 }
 0x152   :  { %v431_v49 = vpack.c.bf16 %v383_v40, %v382_v45  ;;  %v1696_v40 = vld [vmem:[%s2224_s3 + $0x20] ss:$12 sps:$4 sm:$0xff]  }
 0x153   :  { %v355_v22 = vpop.permute.xlu0 %354  ;;  %v314_v23 = vpop.permute.xlu1 %313  ;;  %v773_v45 = vld [vmem:[%s2233_s12 + $0x60] sm:$0xff] }
 0x154   :  { %v323_v47 = vmul.f32 %v1395_v46, %v314_v23  ;;  %v365_v63 = vmul.f32 %v1398_v55, %v355_v22 }
 0x156   :  { %v423_v56 = vpack.c.bf16 %v323_v47, %v322_v52  ;;  %v771_v47 = vld [vmem:[%s2233_s12 + $0x50] sm:$0xff]  ;;  %v766_v52 = vld [vmem:[%s2233_s12 + $0x28] sm:$0xff] }
 0x157   :  { %v295_v24 = vpop.permute.xlu0 %294  ;;  %v357_v25 = vpop.permute.xlu1 %356 }
 0x158   :  { %v366_v58 = vmul.f32 %v1398_v55, %v357_v25 }
 0x15a   :  { %v429_v3 = vpack.c.bf16 %v366_v58, %v365_v63 }
 0x15b   :  { %v297_v26 = vpop.permute.xlu1 %296  ;;  %v385_v27 = vpop.permute.xlu0 %384 }
 0x15c   :  { %v397_v30 = vmul.f32 %v1400_v6, %v385_v27  ;;  %v306_v1 = vmul.f32 %v1394_v0, %v297_v26  ;;  %v1401_v26 = vld [vmem:[%s2232_s11 + $0x8] ss:$0 sm:$0xff] }
 0x15f   :  { %v387_v28 = vpop.permute.xlu1 %386  ;;  %v325_v29 = vpop.permute.xlu0 %324 }
 0x160   :  { %v398_v31 = vmul.f32 %v1400_v6, %v387_v28  ;;  %v337_v43 = vmul.f32 %v1396_v13, %v325_v29  ;;  %v305_v6 = vmul.f32 %v1394_v0, %v295_v24  ;;  %v1692_v29 = vld [vmem:[%s2224_s3 + $0x1c] ss:$12 sps:$4 sm:$0xff]  }
 0x162   :  { %v432_v33 = vpack.c.bf16 %v398_v31, %v397_v30  ;;  %v421_v9 = vpack.c.bf16 %v306_v1, %v305_v6 }
 0x163   :  { %v327_v41 = vpop.permute.xlu1 %326  ;;  %v368_v42 = vpop.permute.xlu0 %367 }
 0x164   :  { %v338_v44 = vmul.f32 %v1396_v13, %v327_v41  ;;  %1454 = vmatprep.subr.bf16.mxu1 %v432_v33  ;;  %v380_v53 = vmul.f32 %v1399_v32, %v368_v42  ;;  %v1697_v41 = vld [vmem:[%s2226_s5] sm:$0xff]   ;;  %v776_v42 = vld [vmem:[%s2233_s12 + $0x78] sm:$0xff] }
 0x166   :  { %v424_v48 = vpack.c.bf16 %v338_v44, %v337_v43  ;;  %v775_v43 = vld [vmem:[%s2233_s12 + $0x70] sm:$0xff]  ;;  %v774_v44 = vld [vmem:[%s2233_s12 + $0x68] sm:$0xff] }
 0x167   :  { %v370_v50 = vpop.permute.xlu1 %369  ;;  %v308_v51 = vpop.permute.xlu0 %307 }
 0x168   :  { %v381_v54 = vmul.f32 %v1399_v32, %v370_v50  ;;  %1455 = vmatpush3.bf16.msra.mxu1 %v424_v48  ;;  %v320_v61 = vmul.f32 %v1395_v46, %v308_v51  ;;  %v770_v48 = vld [vmem:[%s2233_s12 + $0x48] sm:$0xff]  ;;  %v768_v50 = vld [vmem:[%s2233_s12 + $0x38] sm:$0xff]  ;;  %v767_v51 = vld [vmem:[%s2233_s12 + $0x30] sm:$0xff] }
 0x169   :  { %1456 = vmatprep.subr.bf16.mxu1 %v431_v49  ;;  %v769_v49 = vld [vmem:[%s2233_s12 + $0x40] sm:$0xff] }
 0x16a   :  { %v430_v57 = vpack.c.bf16 %v381_v54, %v380_v53  ;;  %v765_v53 = vld [vmem:[%s2233_s12 + $0x20] sm:$0xff]  ;;  %v2091_v54 = vpop.f32.mrf.mxu1 }
 0x16b   :  { %v310_v59 = vpop.permute.xlu1 %309  ;;  %v351_v60 = vpop.permute.xlu0 %350 }
 0x16c   :  { %v321_v62 = vmul.f32 %v1395_v46, %v310_v59  ;;  %1457 = vmatpush3.bf16.msra.mxu1 %v423_v56  ;;  %v363_v7 = vmul.f32 %v1398_v55, %v351_v60  ;;  %v772_v46 = vld [vmem:[%s2233_s12 + $0x58] sm:$0xff] }
 0x16d   :  { %1458 = vmatprep.subr.bf16.mxu1 %v430_v57 }
 0x16e   :  { %v422_v2 = vpack.c.bf16 %v321_v62, %v320_v61 }
 0x16f   :  { %v353_v4 = vpop.permute.xlu1 %352  ;;  %v291_v5 = vpop.permute.xlu0 %290 }
 0x170   :  { %v364_v8 = vmul.f32 %v1398_v55, %v353_v4  ;;  %1459 = vmatpush3.bf16.msra.mxu1 %v422_v2  ;;  %v303_v13 = vmul.f32 %v1394_v0, %v291_v5  ;;  %v2093_v55 = vpop.f32.mrf.mxu1 }
 0x171   :  { %1460 = vmatprep.subr.bf16.mxu1 %v429_v3 }
 0x172   :  { %v428_v10 = vpack.c.bf16 %v364_v8, %v363_v7  ;;  %v2095_v56 = vpop.f32.mrf.mxu1 }
 0x173   :  { %v293_v11 = vpop.permute.xlu1 %292  ;;  %v278_v12 = vpop.permute.xlu0 %277 }
 0x174   :  { %v304_v14 = vmul.f32 %v1394_v0, %v293_v11  ;;  %1461 = vmatpush3.bf16.msra.mxu1 %v421_v9  ;;  %v288_v19 = vmul.f32 %v1393_v15, %v278_v12  ;;  %v2097_v57 = vpop.f32.mrf.mxu1 }
 0x175   :  { %1462 = vmatprep.subr.bf16.mxu1 %v428_v10 }
 0x176   :  { %v420_v16 = vpack.c.bf16 %v304_v14, %v303_v13  ;;  %v2099_v58 = vpop.f32.mrf.mxu1 }
 0x177   :  { %v280_v17 = vpop.permute.xlu1 %279  ;;  %v274_v18 = vpop.permute.xlu0 %273 }
 0x178   :  { %v289_v20 = vmul.f32 %v1393_v15, %v280_v17  ;;  %1463 = vmatpush3.bf16.msra.mxu1 %v420_v16  ;;  %v286_v24 = vmul.f32 %v1393_v15, %v274_v18  ;;  %v2101_v59 = vpop.f32.mrf.mxu1 }
 0x179   :  { %1464 = vmatprep.subr.bf16.mxu1 %v427_v36 }
 0x17a   :  { %v419_v21 = vpack.c.bf16 %v289_v20, %v288_v19  ;;  %v2103_v60 = vpop.f32.mrf.mxu1 }
 0x17b   :  { %v276_v22 = vpop.permute.xlu1 %275  ;;  %v406_v23 = vpop.permute.xlu0 %405 }
 0x17c   :  { %v287_v25 = vmul.f32 %v1393_v15, %v276_v22  ;;  %1465 = vmatpush3.bf16.msra.mxu1 %v419_v21  ;;  %v416_v35 = vmul.f32 %v1401_v26, %v406_v23  ;;  %v2105_v61 = vpop.f32.mrf.mxu1 }
 0x17d   :  { %1466 = vmatprep.subr.bf16.mxu1 %v426_v39  ;;  %v1694_v39 = vld [vmem:[%s2224_s3 + $0x18] ss:$12 sps:$4 sm:$0xff]  }
 0x17e   :  { %v418_v27 = vpack.c.bf16 %v287_v25, %v286_v24 }
 0x17f   :  { %v408_v28 = vpop.permute.xlu1 %407  ;;  %v402_v30 = vpop.permute.xlu0 %401 }
 0x180   :  { %v417_v36 = vmul.f32 %v1401_v26, %v408_v28  ;;  %1467 = vmatpush3.bf16.msra.mxu1 %v418_v27  ;;  %v414_v33 = vmul.f32 %v1401_v26, %v402_v30  ;;  %v1699_v30 = vld [vmem:[%s2226_s5 + $0x10] sm:$0xff]  }
 0x181   :  { %1577 = vmatprep.subr.mxu1 %v776_v42 }
 0x182   :  { %v435_v31 = vpack.c.bf16 %v417_v36, %v416_v35 }
 0x183   :  { %v404_v32 = vpop.permute.xlu1 %403  ;;  %537 = vmatmul.mubr.bf16.vlgmr.msra.gmra.mxu1 %v1689_v34 }
 0x184   :  { %v415_v37 = vmul.f32 %v1401_v26, %v404_v32  ;;  %1557 = vmatprep.subr.bf16.mxu0 %v435_v31  ;;  %544 = vmatprep.mubr.bf16.mxu1 %v1692_v29  ;;  %v1698_v29 = vld [vmem:[%s2226_s5 + $0x8] sm:$0xff]   ;;  %v764_v32 = vld [vmem:[%s2233_s12 + $0x18] sm:$0xff] }
 0x185   :  { %1558 = vmatpush3.bf16.msra.mxu0 %v435_v31  ;;  %1578 = vmatpush3.msra.mxu1 %v776_v42  ;;  %v1700_v31 = vld [vmem:[%s2226_s5 + $0x18] sm:$0xff]  }
 0x186   :  { %v434_v38 = vpack.c.bf16 %v415_v37, %v414_v33  ;;  %1579 = vmatprep.subr.mxu1 %v775_v43  ;;  %v763_v33 = vld [vmem:[%s2233_s12 + $0x10] sm:$0xff]  ;;  %v762_v37 = vld [vmem:[%s2233_s12 + $0x8] sm:$0xff] }
 0x187   :  { %1580 = vmatpush3.msra.mxu1 %v775_v43 }
 0x188   :  { %1559 = vmatprep.subr.bf16.mxu0 %v434_v38  ;;  %1581 = vmatprep.subr.mxu1 %v774_v44 }
 0x189   :  { %1560 = vmatpush3.bf16.msra.mxu0 %v434_v38  ;;  %1582 = vmatpush3.msra.mxu1 %v774_v44  ;;  %v761_v38 = vld [vmem:[%s2233_s12] sm:$0xff] }
 0x18a   :  { %1583 = vmatprep.subr.mxu1 %v773_v45 }
 0x18b   :  { %545 = vmatmul.mubr.bf16.gmra.mxu1 %v1694_v39 }
 0x18c   :  { %1562 = vmatmul.mubr.msk.bf16.vlgmr.msra.gmra.mxu0 %vm169_vm0, %v1696_v40  ;;  %1584 = vmatpush3.msra.mxu1 %v773_v45  ;;  %v461_v5 = vpop.permute.xlu0 %460 }
 0x18d   :  { %1569 = vmatprep.mubr.msk.bf16.mxu0 %vm169_vm0, %v1697_v41  ;;  %1585 = vmatprep.subr.mxu1 %v772_v46 }
 0x18e   :  { %1586 = vmatpush3.msra.mxu1 %v772_v46 }
 0x18f   :  { %1587 = vmatprep.subr.mxu1 %v771_v47 }
 0x190   :  { %1588 = vmatpush3.msra.mxu1 %v771_v47  ;;  %v466_v2 = vpop.permute.xlu1 %465  ;;  %v451_v19 = vpop.permute.xlu0 %450 }
 0x191   :  { %1589 = vmatprep.subr.mxu1 %v770_v48 }
 0x192   :  { %1590 = vmatpush3.msra.mxu1 %v770_v48 }
 0x193   :  { %1591 = vmatprep.subr.mxu1 %v769_v49 }
 0x194   :  { %1592 = vmatpush3.msra.mxu1 %v769_v49  ;;  %v456_v14 = vpop.permute.xlu1 %455  ;;  %v627_v39 = vpop.permute.xlu0 %626 }
 0x195   :  { %1593 = vmatprep.subr.mxu1 %v768_v50 }
 0x196   :  { %1594 = vmatpush3.msra.mxu1 %v768_v50 }
 0x197   :  { %1595 = vmatprep.subr.mxu1 %v767_v51 }
 0x198   :  { %1596 = vmatpush3.msra.mxu1 %v767_v51  ;;  %v632_v40 = vpop.permute.xlu1 %631  ;;  %v637_v43 = vpop.permute.xlu0 %636 }
 0x199   :  { %1597 = vmatprep.subr.mxu1 %v766_v52 }
 0x19a   :  { %1598 = vmatpush3.msra.mxu1 %v766_v52 }
 0x19b   :  { %1599 = vmatprep.subr.mxu1 %v765_v53 }
 0x19c   :  { %1600 = vmatpush3.msra.mxu1 %v765_v53  ;;  %v642_v46 = vpop.permute.xlu1 %641  ;;  %v647_v51 = vpop.permute.xlu0 %646 }
 0x19d   :  { %1601 = vmatprep.subr.mxu1 %v764_v32 }
 0x19e   :  { %1602 = vmatpush3.msra.mxu1 %v764_v32 }
 0x19f   :  { %1603 = vmatprep.subr.mxu1 %v763_v33 }
 0x1a0   :  { %1604 = vmatpush3.msra.mxu1 %v763_v33 }
 0x1a1   :  { %1605 = vmatprep.subr.mxu1 %v762_v37 }
 0x1a2   :  { %1606 = vmatpush3.msra.mxu1 %v762_v37 }
 0x1a3   :  { %1607 = vmatprep.subr.mxu1 %v761_v38 }
 0x1a4   :  { %1608 = vmatpush3.msra.mxu1 %v761_v38 }
 0x243   :  { %v1468_v62 = vpop.f32.mrf.mxu1 }
 0x245   :  { %v1469_v63 = vpop.f32.mrf.mxu1 }
 0x246   :  { %v1470_v11 = vadd.f32 %v1469_v63, %v1468_v62  ;;  %v652_v63 = vpop.permute.xlu1 %651 }
 0x247   :  { %v1471_v0 = vpop.f32.mrf.mxu1 }
 0x248   :  { %v539_v21 = vadd.f32 %v1470_v11, %v451_v19 }
 0x249   :  { %v1472_v1 = vpop.f32.mrf.mxu1 }
 0x24a   :  { %v1473_v7 = vadd.f32 %v1472_v1, %v1471_v0 }
 0x24b   :  { %v1474_v3 = vpop.f32.mrf.mxu1 }
 0x24c   :  { %v1563_v4 = vpop.f32.mrf.mxu0  ;;  %v542_v17 = vadd.f32 %v1473_v7, %v456_v14  ;;  %v1764_v7 = vmov 0.0  }
 0x24d   :  { %v1475_v6 = vpop.f32.mrf.mxu1 }
 0x24e   :  { %v1476_v8 = vadd.f32 %v1475_v6, %v1474_v3  ;;  %v587_v9 = vpop.f32.mrf.mxu0 }
 0x24f   :  { %v1477_v10 = vpop.f32.mrf.mxu1  ;;  %v588_v24 = vadd.f32 %v587_v9, %v539_v21 }
 0x250   :  { %v547_v12 = vadd.f32 %v1476_v8, %v461_v5  ;;  %v1564_v13 = vpop.f32.mrf.mxu0  ;;  %v662_v5 = vpop.permute.xlu1 %661 }
 0x251   :  { %v1478_v15 = vpop.f32.mrf.mxu1  ;;  %v602_v34 = vmax.f32 %v588_v24, 0.0  ;;  %v966_v24 = vld [vmem:[%s2230_s9 + $0x10] sm:$0xff] }
 0x252   :  { %v1479_v16 = vadd.f32 %v1478_v15, %v1477_v10  ;;  %v590_v18 = vpop.f32.mrf.mxu0  ;;  %v596_v20 = vadd.f32 %v1563_v4, %v547_v12 }
 0x253   :  { %v591_v23 = vadd.f32 %v590_v18, %v542_v17  ;;  %v964_v17 = vld [vmem:[%s2230_s9] sm:$0xff] }
 0x254   :  { %v550_v22 = vadd.f32 %v1479_v16, %v466_v2  ;;  %v604_v26 = vmax.f32 %v596_v20, 0.0  ;;  %v657_v2 = vpop.permute.xlu0 %656  ;;  %v882_v16 = vld [vmem:[%s2228_s7] sm:$0xff] }
 0x255   :  { %v603_v28 = vmax.f32 %v591_v23, 0.0  ;;  %v965_v23 = vld [vmem:[%s2230_s9 + $0x8] sm:$0xff] }
 0x256   :  { %v599_v25 = vadd.f32 %v1564_v13, %v550_v22 }
 0x257   :  { %v614_v36 = vpack.c.bf16 %v603_v28, %v602_v34  ;;  %v970_v28 = vld [vmem:[%s2230_s9 + $0x30] sm:$0xff]  ;;  %v971_v34 = vld [vmem:[%s2230_s9 + $0x38] sm:$0xff] }
 0x258   :  { %v605_v27 = vmax.f32 %v599_v25, 0.0  ;;  %v887_v18 = vpop.permute.xlu0 %886  ;;  %v967_v25 = vld [vmem:[%s2230_s9 + $0x18] sm:$0xff] }
 0x25a   :  { %v615_v35 = vpack.c.bf16 %v605_v27, %v604_v26  ;;  %v968_v26 = vld [vmem:[%s2230_s9 + $0x20] sm:$0xff]  ;;  %v969_v27 = vld [vmem:[%s2230_s9 + $0x28] sm:$0xff]  ;;  %s1766_s9 = smov [#allocation2]  }
 0x25c   :  { %1565 = vmatprep.subr.bf16.mxu0 %v615_v35 }
 0x25d   :  { %1566 = vmatpush3.bf16.msra.mxu0 %v615_v35  ;;  %v1198_v35 = vld [vmem:[%s2234_s13] sm:$0x3]  ;;  %s1370_s13 = sshll.u32 %s1766_s9, 4  ;;  %s1371_s13 = int_to_ptr.vmem [resolvable:$true] %s1370_s13 }
 0x25e   :  { %1567 = vmatprep.subr.bf16.mxu0 %v614_v36  ;;  %s1733_s1 = scalar_lea.vmem %s1371_s13, 1024  ;;  %p1738_p1 = scmp.lt.s32.totalorder %s1371_s13, %s1371_s13 }
 0x25f   :  { %p1734_p0 = scmp.ne.s32.totalorder %s1371_s13, %s1733_s1  ;;  %p1739_p2 = scmp.lt.s32.totalorder %s1733_s1, %s1733_s1 }
 0x261   :  { %1568 = vmatpush3.bf16.msra.mxu0 %v614_v36  ;;  %v988_v36 = vpop.permute.xlu0 %987  ;;  %p1740_p3 = por %p1739_p2, %p1738_p1 }
 0x262   :  { %1621 = vmatprep.subr.mxu0 %v1764_v7 }
 0x263   :  { %p1741_p4 = pnand %p1740_p3, %p1734_p0 }
 0x264   :  { %1570 = vmatmul.mubr.msk.bf16.vlgmr.msra.gmra.mxu0 %vm169_vm0, %v1698_v29  ;;  %v983_v29 = vpop.permute.xlu1 %982 }
 0x265   :  { %1573 = vmatprep.mubr.msk.bf16.mxu0 %vm169_vm0, %v1699_v30  ;;  %v998_v30 = vpop.permute.xlu0 %997 }
 0x268   :  { %v993_v33 = vpop.permute.xlu1 %992 }
 0x26c   :  { %1574 = vmatmul.mubr.msk.bf16.gmra.mxu0 %vm169_vm0, %v1700_v31 }
 0x26d   :  { %1637 = vmatprep.mubr.msk.f32.mxu0 %vm1765_vm1, %v1764_v7 }
 0x324   :  { %v1571_v41 = vpop.f32.mrf.mxu0 }
 0x325   :  { %v2136_v49 = vadd.f32 %v1571_v41, %v637_v43  ;;  %v1008_v43 = vpop.permute.xlu0 %1007 }
 0x326   :  { %v730_v42 = vpop.f32.mrf.mxu0 }
 0x327   :  { %v2131_v44 = vadd.f32 %v730_v42, %v627_v39 }
 0x328   :  { %v1572_v45 = vpop.f32.mrf.mxu0 }
 0x329   :  { %1609 = vmatprep.mubr.f32.mxu1 %v2131_v44  ;;  %v2140_v53 = vadd.f32 %v1572_v45, %v642_v46 }
 0x32a   :  { %v733_v47 = vpop.f32.mrf.mxu0 }
 0x32b   :  { %v2134_v48 = vadd.f32 %v733_v47, %v632_v40 }
 0x32c   :  { %v1575_v50 = vpop.f32.mrf.mxu0 }
 0x32d   :  { %1610 = vmatmul.mubr.f32.vlgmr.msra.gmra.mxu1 %v2134_v48  ;;  %v2148_v4 = vadd.f32 %v1575_v50, %v657_v2  ;;  %v1003_v50 = vpop.permute.xlu1 %1002 }
 0x32e   :  { %v746_v52 = vpop.f32.mrf.mxu0  ;;  %1612 = vmatprep.mubr.f32.mxu1 %v2136_v49 }
 0x32f   :  { %v2142_v62 = vadd.f32 %v746_v52, %v647_v51 }
 0x330   :  { %v1576_v0 = vpop.f32.mrf.mxu0 }
 0x331   :  { %1613 = vmatmul.mubr.f32.gmra.mxu1 %v2140_v53  ;;  %v2152_v6 = vadd.f32 %v1576_v0, %v662_v5  ;;  %v1018_v5 = vpop.permute.xlu0 %1017 }
 0x332   :  { %v749_v1 = vpop.f32.mrf.mxu0  ;;  %1615 = vmatprep.mubr.f32.mxu1 %v2142_v62 }
 0x333   :  { %v2146_v3 = vadd.f32 %v749_v1, %v652_v63 }
 0x335   :  { %1616 = vmatmul.mubr.f32.gmra.mxu1 %v2146_v3 }
 0x336   :  { %1618 = vmatprep.mubr.f32.mxu1 %v2148_v4 }
 0x339   :  { %1619 = vmatmul.mubr.f32.gmra.mxu1 %v2152_v6 }
 0x3ed   :  { %v1611_v8 = vpop.f32.mrf.mxu1 }
 0x3ef   :  { %v843_v9 = vpop.f32.mrf.mxu1 }
 0x3f1   :  { %v1614_v10 = vpop.f32.mrf.mxu1 }
 0x3f3   :  { %v853_v11 = vpop.f32.mrf.mxu1 }
 0x3f5   :  { %v1617_v12 = vpop.f32.mrf.mxu1 }
 0x3f7   :  { %v863_v13 = vpop.f32.mrf.mxu1 }
 0x3f9   :  { %v1620_v14 = vpop.f32.mrf.mxu1 }
 0x3fa   :  { %1622 = vmatpush3.msra.mxu0 %v1620_v14 }
 0x3fb   :  { %v873_v15 = vpop.f32.mrf.mxu1  ;;  %1623 = vmatprep.subr.mxu0 %v1764_v7 }
 0x3fc   :  { %1624 = vmatpush3.msra.mxu0 %v873_v15 }
 0x3fd   :  { %1625 = vmatprep.subr.mxu0 %v1764_v7 }
 0x3fe   :  { %1626 = vmatpush3.msra.mxu0 %v1617_v12 }
 0x3ff   :  { %1627 = vmatprep.subr.mxu0 %v1764_v7 }
 0x400   :  { %1628 = vmatpush3.msra.mxu0 %v863_v13 }
 0x401   :  { %1629 = vmatprep.subr.mxu0 %v1764_v7 }
 0x402   :  { %1630 = vmatpush3.msra.mxu0 %v1614_v10  ;;  %v1013_v10 = vpop.permute.xlu1 %1012 }
 0x403   :  { %1631 = vmatprep.subr.mxu0 %v1764_v7 }
 0x404   :  { %1632 = vmatpush3.msra.mxu0 %v853_v11 }
 0x405   :  { %1633 = vmatprep.subr.mxu0 %v1764_v7 }
 0x406   :  { %1634 = vmatpush3.msra.mxu0 %v1611_v8 }
 0x407   :  { %1635 = vmatprep.subr.mxu0 %v1764_v7 }
 0x408   :  { %1636 = vmatpush3.msra.mxu0 %v843_v9 }
 0x409   :  { %1638 = vmatmul.mubr.msk.f32.vlgmr.msra.gmra.mxu0 %vm889_vm2, %v882_v16 }
 0x40a   :  { %1642 = vmatprep.mubr.msk.f32.mxu0 %vm1020_vm3, %v964_v17 }
 0x4c9   :  { %v959_v19 = vpop.f32.mrf.mxu0 }
 0x4ca   :  { %v960_v20 = vadd.f32 %v959_v19, %v887_v18 }
 0x4cb   :  { %v1639_v21 = vpop.f32.mrf.mxu0 }
 0x4cc   :  { %v963_v22 = vmax.f32 %v960_v20, 0.0 }
 0x4ce   :  { %1640 = vmatprep.subr.mxu0 %v963_v22 }
 0x4cf   :  { %1641 = vmatpush3.msra.mxu0 %v963_v22 }
 0x4d0   :  { %1643 = vmatmul.mubr.msk.f32.vlgmr.msra.gmra.mxu0 %vm1020_vm3, %v965_v23  ;;  %1654 = vmatprep.subr.msk.mxu0 %vm1224_vm4, %v1198_v35 }
 0x4d1   :  { %1645 = vmatprep.mubr.msk.f32.mxu0 %vm1020_vm3, %v966_v24  ;;  %1655 = vmatpush3.msk.msra.mxu0 %vm1224_vm4, %v1198_v35 }
 0x4d4   :  { %1646 = vmatmul.mubr.msk.f32.gmra.mxu0 %vm1020_vm3, %v967_v25 }
 0x4d5   :  { %1648 = vmatprep.mubr.msk.f32.mxu0 %vm1020_vm3, %v968_v26 }
 0x4d8   :  { %1649 = vmatmul.mubr.msk.f32.gmra.mxu0 %vm1020_vm3, %v969_v27 }
 0x4d9   :  { %1651 = vmatprep.mubr.msk.f32.mxu0 %vm1020_vm3, %v970_v28 }
 0x4dc   :  { %1652 = vmatmul.mubr.msk.f32.gmra.mxu0 %vm1020_vm3, %v971_v34 }
 0x590   :  { %v1644_v31 = vpop.f32.mrf.mxu0 }
 0x591   :  { %v1117_v32 = vadd.f32 %v1644_v31, %v988_v36 }
 0x592   :  { %v1111_v37 = vpop.f32.mrf.mxu0 }
 0x593   :  { %v1428_v38 = vmul.f32 -1.442695, %v1117_v32  ;;  %v1112_v39 = vadd.f32 %v1111_v37, %v983_v29 }
 0x594   :  { %v1647_v40 = vpop.f32.mrf.mxu0 }
 0x595   :  { %1701 = vpow2.f32 %v1428_v38  ;;  %v1427_v41 = vmul.f32 -1.442695, %v1112_v39  ;;  %v1127_v42 = vadd.f32 %v1647_v40, %v998_v30  ;;  %v107_v39 = vpop.permute.xlu0 %106  ;;  %v102_v40 = vpop.permute.xlu1 %101 }
 0x596   :  { %v1121_v45 = vpop.f32.mrf.mxu0 }
 0x597   :  { %1703 = vpow2.f32 %v1427_v41  ;;  %v1430_v46 = vmul.f32 -1.442695, %v1127_v42  ;;  %v1122_v47 = vadd.f32 %v1121_v45, %v993_v33  ;;  %v242_v45 = vadd.f32 %v2097_v57, %v107_v39 }
 0x598   :  { %v1650_v51 = vpop.f32.mrf.mxu0 }
 0x599   :  { %1705 = vpow2.f32 %v1430_v46  ;;  %v1429_v52 = vmul.f32 -1.442695, %v1122_v47  ;;  %v1137_v63 = vadd.f32 %v1650_v51, %v1008_v43  ;;  %v117_v41 = vpop.permute.xlu0 %116  ;;  %v112_v42 = vpop.permute.xlu1 %111 }
 0x59a   :  { %v1131_v0 = vpop.f32.mrf.mxu0  ;;  %v247_v57 = vadd.f32 %v2091_v54, %v112_v42 }
 0x59b   :  { %1707 = vpow2.f32 %v1429_v52  ;;  %v1432_v1 = vmul.f32 -1.442695, %v1137_v63  ;;  %v1132_v2 = vadd.f32 %v1131_v0, %v1003_v50  ;;  %v239_v50 = vadd.f32 %v2093_v55, %v102_v40 }
 0x59c   :  { %v1653_v7 = vpop.f32.mrf.mxu0 }
 0x59d   :  { %1709 = vpow2.f32 %v1432_v1  ;;  %v1431_v8 = vmul.f32 -1.442695, %v1132_v2  ;;  %v1147_v9 = vadd.f32 %v1653_v7, %v1018_v5  ;;  %v127_v63 = vpop.permute.xlu0 %126  ;;  %v250_v1 = vadd.f32 %v2095_v56, %v117_v41 }
 0x59e   :  { %v1141_v11 = vpop.f32.mrf.mxu0 }
 0x59f   :  { %1711 = vpow2.f32 %v1431_v8  ;;  %v1434_v12 = vmul.f32 -1.442695, %v1147_v9  ;;  %v1142_v13 = vadd.f32 %v1141_v11, %v1013_v10  ;;  %v122_v8 = vpop.permute.xlu1 %121 }
 0x5a1   :  { %1713 = vpow2.f32 %v1434_v12  ;;  %v1433_v14 = vmul.f32 -1.442695, %v1142_v13 }
 0x5a2   :  { %v1702_v15 = vpop.eup %1701 }
 0x5a3   :  { %1715 = vpow2.f32 %v1433_v14  ;;  %v1175_v17 = vadd.f32 1.0, %v1702_v15  ;;  %v137_v14 = vpop.permute.xlu0 %136 }
 0x5a4   :  { %v1704_v16 = vpop.eup %1703 }
 0x5a5   :  { %v1174_v18 = vadd.f32 1.0, %v1704_v16 }
 0x5a6   :  { %v1706_v19 = vpop.eup %1705 }
 0x5a7   :  { %1717 = vrcp.f32 %v1174_v18  ;;  %v1177_v21 = vadd.f32 1.0, %v1706_v19  ;;  %v132_v18 = vpop.permute.xlu1 %131 }
 0x5a8   :  { %v1708_v20 = vpop.eup %1707  ;;  %1719 = vrcp.f32 %v1175_v17 }
 0x5a9   :  { %v1176_v22 = vadd.f32 1.0, %v1708_v20 }
 0x5aa   :  { %v1710_v23 = vpop.eup %1709 }
 0x5ab   :  { %1721 = vrcp.f32 %v1176_v22  ;;  %v1179_v25 = vadd.f32 1.0, %v1710_v23 }
 0x5ac   :  { %v1712_v24 = vpop.eup %1711  ;;  %1723 = vrcp.f32 %v1177_v21 }
 0x5ad   :  { %v1178_v26 = vadd.f32 1.0, %v1712_v24 }
 0x5ae   :  { %v1714_v27 = vpop.eup %1713 }
 0x5af   :  { %1725 = vrcp.f32 %v1178_v26  ;;  %v1181_v34 = vadd.f32 1.0, %v1714_v27 }
 0x5b0   :  { %v1716_v28 = vpop.eup %1715  ;;  %1727 = vrcp.f32 %v1179_v25 }
 0x5b1   :  { %v1180_v35 = vadd.f32 1.0, %v1716_v28 }
 0x5b3   :  { %1729 = vrcp.f32 %v1180_v35 }
 0x5b4   :  { %v1718_v36 = vpop.eup %1717  ;;  %1731 = vrcp.f32 %v1181_v34 }
 0x5b5   :  { %v1720_v29 = vpop.eup %1719  ;;  %1656 = vmatprep.mubr.msk.f32.mxu0 %vm1199_vm5, %v1718_v36 }
 0x5b6   :  { %1657 = vmatmul.mubr.msk.f32.vlgmr.msra.gmra.mxu0 %vm1199_vm5, %v1720_v29 }
 0x5b8   :  { %v1722_v30 = vpop.eup %1721 }
 0x5b9   :  { %v1724_v31 = vpop.eup %1723  ;;  %1659 = vmatprep.mubr.msk.f32.mxu0 %vm1199_vm5, %v1722_v30 }
 0x5ba   :  { %1660 = vmatmul.mubr.msk.f32.gmra.mxu0 %vm1199_vm5, %v1724_v31 }
 0x5bc   :  { %v1726_v32 = vpop.eup %1725 }
 0x5bd   :  { %v1728_v33 = vpop.eup %1727  ;;  %1662 = vmatprep.mubr.msk.f32.mxu0 %vm1199_vm5, %v1726_v32 }
 0x5be   :  { %1663 = vmatmul.mubr.msk.f32.gmra.mxu0 %vm1199_vm5, %v1728_v33 }
 0x5c0   :  { %v1730_v37 = vpop.eup %1729 }
 0x5c1   :  { %v1732_v38 = vpop.eup %1731  ;;  %1665 = vmatprep.mubr.msk.f32.mxu0 %vm1199_vm5, %v1730_v37 }
 0x5c2   :  { %1666 = vmatmul.mubr.msk.f32.gmra.mxu0 %vm1199_vm5, %v1732_v38 }
 0x676   :  { %v1658_v43 = vpop.f32.mrf.mxu0 }
 0x677   :  { %v1334_v46 = vmul.f32 %v1658_v43, %v2134_v48 }
 0x678   :  { %v1294_v47 = vpop.f32.mrf.mxu0 }
 0x679   :  { %v1342_v51 = vadd.f32 %v1334_v46, %v242_v45  ;;  %v1333_v52 = vmul.f32 %v1294_v47, %v2131_v44  ;;  %v258_v44 = vadd.f32 %v2105_v61, %v127_v63 }
 0x67a   :  { %v1661_v0 = vpop.f32.mrf.mxu0 }
 0x67b   :  { %v1350_v2 = vmax.f32 %v1342_v51, 0.0  ;;  %v1341_v5 = vadd.f32 %v1333_v52, %v239_v50  ;;  %v1336_v7 = vmul.f32 %v1661_v0, %v2140_v53  ;;  %v255_v53 = vadd.f32 %v2101_v59, %v122_v8 }
 0x67c   :  { %v1304_v9 = vpop.f32.mrf.mxu0 }
 0x67d   :  { %1358 = vst [vmem:[#allocation2 + $0x8] sm:$0xff] %v1350_v2  ;;  %v1349_v48 = vmax.f32 %v1341_v5, 0.0  ;;  %v1344_v10 = vadd.f32 %v1336_v7, %v250_v1  ;;  %v1335_v55 = vmul.f32 %v1304_v9, %v2136_v49  ;;  %v266_v49 = vadd.f32 %v2103_v60, %v137_v14 }
 0x67e   :  { %v1664_v11 = vpop.f32.mrf.mxu0 }
 0x67f   :  { %1357 = vst [vmem:[#allocation2] sm:$0xff] %v1349_v48  ;;  %v1352_v12 = vmax.f32 %v1344_v10, 0.0  ;;  %v1343_v13 = vadd.f32 %v1335_v55, %v247_v57  ;;  %v1338_v56 = vmul.f32 %v1664_v11, %v2146_v3  ;;  %v263_v3 = vadd.f32 %v2099_v58, %v132_v18 }
 0x680   :  { %v1314_v15 = vpop.f32.mrf.mxu0 }
 0x681   :  { %1360 = vst [vmem:[#allocation2 + $0x18] sm:$0xff] %v1352_v12  ;;  %v1351_v16 = vmax.f32 %v1343_v13, 0.0  ;;  %v1346_v54 = vadd.f32 %v1338_v56, %v258_v44  ;;  %v1337_v17 = vmul.f32 %v1314_v15, %v2142_v62 }
 0x682   :  { %v1667_v19 = vpop.f32.mrf.mxu0 }
 0x683   :  { %1359 = vst [vmem:[#allocation2 + $0x10] sm:$0xff] %v1351_v16  ;;  %v1354_v61 = vmax.f32 %v1346_v54, 0.0  ;;  %v1345_v20 = vadd.f32 %v1337_v17, %v255_v53  ;;  %v1340_v21 = vmul.f32 %v1667_v19, %v2152_v6 }
 0x684   :  { %v1324_v22 = vpop.f32.mrf.mxu0 }
 0x685   :  { %1362 = vst [vmem:[#allocation2 + $0x28] sm:$0xff] %v1354_v61  ;;  %v1353_v23 = vmax.f32 %v1345_v20, 0.0  ;;  %v1348_v59 = vadd.f32 %v1340_v21, %v266_v49  ;;  %v1339_v24 = vmul.f32 %v1324_v22, %v2148_v4 }
 0x687   :  { %1361 = vst [vmem:[#allocation2 + $0x20] sm:$0xff] %v1353_v23  ;;  %v1356_v62 = vmax.f32 %v1348_v59, 0.0  ;;  %v1347_v25 = vadd.f32 %v1339_v24, %v263_v3 }
 0x689   :  { %1364 = vst [vmem:[#allocation2 + $0x38] sm:$0xff] %v1356_v62  ;;  %v1355_v60 = vmax.f32 %v1347_v25, 0.0 }
 0x68b   :  { %1363 = vst [vmem:[#allocation2 + $0x30] sm:$0xff] %v1355_v60 }
 0x68c   :  { %1744 = shalt.err (!%p1741_p4)
}
 0x68d   :  { %s1767_s0 = smov 128  }
 0x68e   :  { %1376 = dma.vmem_to_hbm [thread:$0]  %s1371_s13, 1024, %s2235_s14, [#allocation3], %s1767_s0, %s1767_s0, %s1761_s29  }
 0x68f   :  { %1753 = dma.done.wait [#allocation3], 1024  }
 0x690   :  { %1754 = vsyncadd [#allocation3], 4294966272 }
 0x691   :  { %1380 = vsyncpa [#allocation3], 1 }

</bundles_post_ra>
